<compile_context>
chip_gen: v7x
topology: tpu7x:2x2x1
jax: 0.10.0
libtpu: 0.0.40
codegen_flags: <defaults>
</compile_context>

<pallas_src>
import jax
import jax.numpy as jnp
from jax.experimental import pallas as pl
from jax.experimental.pallas import tpu as pltpu

_TARGET_BLOCK_BYTES = 4 * 1024 * 1024  # ~4 MiB f32 input block per operand per step


def _num_tensorcores() -> int:
    """2 on dual-TensorCore chips (v4 / v5p / v7x), else 1.  Safe on CPU."""
    try:
        dev = jax.devices()[0]
        if dev.platform != "tpu":
            return 1
        kind = dev.device_kind.lower()
        return 2 if any(tag in kind for tag in ("v4", "v5p", "v7")) else 1
    except Exception:
        return 1


def _sum_sq_diff_kernel(recon_ref, x_ref, out_ref, acc_ref):
    """Streaming sum((recon - x)^2) over one core's contiguous row range."""
    # program_id / num_programs only at the top level of the kernel body
    # (inside pl.when bodies they fail the CPU/interpret lowering path).
    s = pl.program_id(1)
    last = pl.num_programs(1) - 1

    @pl.when(s == 0)
    def _init():
        acc_ref[...] = jnp.zeros_like(acc_ref)

    diff = recon_ref[...].astype(jnp.float32) - x_ref[...].astype(jnp.float32)
    tr, ln = diff.shape
    # Fold the (tile_rows, lane) squared diffs into an (8, lane) accumulator:
    # vreg-aligned 8-sublane slab adds (pure VALU, no cross-lane work), which
    # cuts VMEM store traffic and shrinks the epilogue reduce by tile_rows/8.
    acc_ref[...] += (diff * diff).reshape(tr // 8, 8, ln).sum(axis=0)

    @pl.when(s == last)
    def _finalize():
        out_ref[...] = jnp.full(out_ref.shape, jnp.sum(acc_ref[...]),
                                dtype=jnp.float32)


def custom_loss(recon_x, x, mu, logvar):
    """Pallas TPU equivalent of customLoss.forward.

    recon_x, x: matching shapes (e.g. NCHW [B, C, H, W])
    mu, logvar: matching shapes (e.g. [B, Z])
    Returns float32 scalar: sum-MSE(recon_x, x) + 0.005 * KLD(mu, logvar).
    """
    n = recon_x.size

    flat_r = recon_x.reshape(-1)
    flat_x = x.reshape(-1)

    # Lane-dense 2-D view with NO padded copy: pick the widest lane count that
    # divides n (reshape is then a bitcast).  Common NN sizes hit this path.
    lane = None
    for cand in (1024, 512, 256, 128):
        if n % cand == 0 and n // cand >= 8:
            lane = cand
            break
    if lane is None:
        # Rare fallback (tiny or non-128-multiple inputs): pad the flat tail up
        # to an (8,128)-aligned shape.  Both operands get identical zero pads,
        # so padded diffs are exactly 0.
        lane = 128
        rows_total = max(8, pl.cdiv(n, lane))
        pad = rows_total * lane - n
        flat_r = jnp.pad(flat_r, (0, pad))
        flat_x = jnp.pad(flat_x, (0, pad))
    else:
        rows_total = n // lane

    recon2d = flat_r.reshape(rows_total, lane)
    x2d = flat_x.reshape(rows_total, lane)

    ncores = _num_tensorcores()
    # ~4 MiB per input block: 2 operands x 2 pipeline buffers ~= 16 MiB VMEM,
    # comfortably under the 32 MiB limit set below on v5e/v6e/v7x.
    rows_cap = max(8, (_TARGET_BLOCK_BYTES // (lane * 4)) // 8 * 8)
    tile_rows = max(8, min(rows_cap, (rows_total // 8) * 8))
    if ncores > 1 and rows_total < 2 * ncores * tile_rows:
        ncores = 1  # not enough rows for a useful 2-TensorCore split
    steps = rows_total // (tile_rows * ncores)
    rows_main = steps * tile_rows * ncores  # exactly-tiled prefix: no masking,
                                            # no ragged or out-of-bounds blocks

    img_spec = pl.BlockSpec((tile_rows, lane), lambda c, s: (c * steps + s, 0))

    itemsize = recon_x.dtype.itemsize
    cost = pl.CostEstimate(
        flops=int(3 * rows_main * lane),
        transcendentals=0,
        bytes_accessed=int(2 * rows_main * lane * itemsize + ncores * 8 * 128 * 4),
    )

    partials = pl.pallas_call(
        _sum_sq_diff_kernel,
        out_shape=jax.ShapeDtypeStruct((ncores, 8, 128), jnp.float32),
        grid_spec=pltpu.PrefetchScalarGridSpec(
            num_scalar_prefetch=0,
            grid=(ncores, steps),
            in_specs=[img_spec, img_spec],
            out_specs=pl.BlockSpec((1, 8, 128), lambda c, s: (c, 0, 0)),
            scratch_shapes=[pltpu.VMEM((8, lane), jnp.float32)],
        ),
        compiler_params=pltpu.CompilerParams(
            dimension_semantics=("parallel", "arbitrary"),
            vmem_limit_bytes=32 * 1024 * 1024,
        ),
        cost_estimate=cost,
    )(recon2d, x2d)

    mse = jnp.sum(partials[:, 0, 0])

    # Un-tiled row tail (< tile_rows * ncores rows): one fused read-and-reduce
    # in plain JAX — negligible next to the streamed prefix, and avoids the
    # full-tensor padded copies the previous version materialized.
    if rows_main < rows_total:
        tail_d = (recon2d[rows_main:].astype(jnp.float32)
                  - x2d[rows_main:].astype(jnp.float32))
        mse = mse + jnp.sum(tail_d * tail_d)

    # Tiny KLD term (a few KB) computed in the wrapper where it fuses with the
    # final scalar sum; keeps the kernel epilogue short and the in_specs simple.
    muf = mu.astype(jnp.float32)
    lvf = logvar.astype(jnp.float32)
    kld = -0.5 * jnp.sum(1.0 + lvf - muf * muf - jnp.exp(lvf))
    return mse + jnp.float32(0.005) * kld


if __name__ == "__main__":
    key = jax.random.PRNGKey(0)
    k1, k2, k3, k4 = jax.random.split(key, 4)

    # Small VAE-like shapes: images [B, C, H, W], latents [B, Z]
    B, C, H, W, Z = 2, 4, 16, 16, 32
    recon_x = jax.random.normal(k1, (B, C, H, W), dtype=jnp.float32)
    x = jax.random.normal(k2, (B, C, H, W), dtype=jnp.float32)
    mu = jax.random.normal(k3, (B, Z), dtype=jnp.float32) * 0.5
    logvar = jax.random.normal(k4, (B, Z), dtype=jnp.float32) * 0.1

    loss_fn = jax.jit(custom_loss)
    loss = loss_fn(recon_x, x, mu, logvar)
    jax.block_until_ready(loss)

    # Reference check in plain JAX
    ref_mse = jnp.sum((recon_x - x) ** 2)
    ref_kld = -0.5 * jnp.sum(1.0 + logvar - mu ** 2 - jnp.exp(logvar))
    ref = ref_mse + 0.005 * ref_kld
    assert jnp.allclose(loss, ref, rtol=1e-5, atol=1e-5), (loss, ref)

    print("KERNEL_OK")
</pallas_src>

<mosaic_0001>
module attributes {stable_mosaic.version = 11 : i64} {
  func.func @_sum_sq_diff_kernel(%arg0: i32, %arg1: i32, %arg2: memref<8x256xf32, #tpu.memory_space<vmem>>, %arg3: memref<8x256xf32, #tpu.memory_space<vmem>>, %arg4: memref<1x8x128xf32, #tpu.memory_space<vmem>>, %arg5: memref<8x256xf32, #tpu.memory_space<vmem>>) attributes {dimension_semantics = [#tpu.dimension_semantics<parallel>, #tpu.dimension_semantics<arbitrary>], iteration_bounds = array<i64: 1, 1>, scalar_prefetch = 0 : i64, scratch_operands = 1 : i64, tpu.core_type = #tpu.core_type<tc>, window_params = [{transform_indices = @transform_0, window_bounds = array<i64: 8, 256>}, {transform_indices = @transform_1, window_bounds = array<i64: 8, 256>}, {transform_indices = @transform_2, window_bounds = array<i64: 1, 8, 128>}]} {
    %c0_i32 = arith.constant 0 : i32
    %0 = arith.cmpi eq, %arg1, %c0_i32 : i32
    %1 = arith.extui %0 : i1 to i32
    %c0_i32_0 = arith.constant 0 : i32
    %2 = arith.cmpi ne, %1, %c0_i32_0 : i32
    scf.if %2 {
      %cst_10 = arith.constant 0.000000e+00 : f32
      %15 = vector.broadcast %cst_10 : f32 to vector<8x256xf32>
      %c0_11 = arith.constant 0 : index
      %c0_12 = arith.constant 0 : index
      %16 = vector.load %arg5[%c0_11, %c0_12] : memref<8x256xf32, #tpu.memory_space<vmem>>, vector<8x256xf32>
      tpu.vector_store %arg5[%c0_11, %c0_12], %15 {strides = array<i32>} : memref<8x256xf32, #tpu.memory_space<vmem>>, vector<8x256xf32>,
    } else {
    }
    %c0 = arith.constant 0 : index
    %c0_1 = arith.constant 0 : index
    %3 = vector.load %arg2[%c0, %c0_1] : memref<8x256xf32, #tpu.memory_space<vmem>>, vector<8x256xf32>
    %c0_2 = arith.constant 0 : index
    %c0_3 = arith.constant 0 : index
    %4 = vector.load %arg3[%c0_2, %c0_3] : memref<8x256xf32, #tpu.memory_space<vmem>>, vector<8x256xf32>
    %5 = arith.subf %3, %4 : vector<8x256xf32>
    %c0_4 = arith.constant 0 : index
    %c0_5 = arith.constant 0 : index
    %6 = vector.load %arg5[%c0_4, %c0_5] : memref<8x256xf32, #tpu.memory_space<vmem>>, vector<8x256xf32>
    %7 = arith.mulf %5, %5 : vector<8x256xf32>
    %8 = vector.shape_cast %7 : vector<8x256xf32> to vector<1x8x256xf32>
    %cst = arith.constant dense<0.000000e+00> : vector<8x256xf32>
    %9 = vector.multi_reduction <add>, %8, %cst [0] : vector<1x8x256xf32> to vector<8x256xf32>
    %10 = arith.addf %6, %9 : vector<8x256xf32>
    %c0_6 = arith.constant 0 : index
    %c0_7 = arith.constant 0 : index
    %11 = vector.load %arg5[%c0_6, %c0_7] : memref<8x256xf32, #tpu.memory_space<vmem>>, vector<8x256xf32>
    tpu.vector_store %arg5[%c0_6, %c0_7], %10 {strides = array<i32>} : memref<8x256xf32, #tpu.memory_space<vmem>>, vector<8x256xf32>,
    %c0_i32_8 = arith.constant 0 : i32
    %12 = arith.cmpi eq, %arg1, %c0_i32_8 : i32
    %13 = arith.extui %12 : i1 to i32
    %c0_i32_9 = arith.constant 0 : i32
    %14 = arith.cmpi ne, %13, %c0_i32_9 : i32
    scf.if %14 {
      %c0_10 = arith.constant 0 : index
      %c0_11 = arith.constant 0 : index
      %15 = vector.load %arg5[%c0_10, %c0_11] : memref<8x256xf32, #tpu.memory_space<vmem>>, vector<8x256xf32>
      %16 = vector.shape_cast %15 : vector<8x256xf32> to vector<1x8x256xf32>
      %cst_12 = arith.constant dense<0.000000e+00> : vector<1xf32>
      %17 = vector.multi_reduction <add>, %16, %cst_12 [1, 2] : vector<1x8x256xf32> to vector<1xf32>
      %18 = vector.shape_cast %17 : vector<1xf32> to vector<1x1x1xf32>
      %19 = vector.extract %18[0, 0, 0] : f32 from vector<1x1x1xf32>
      %20 = vector.broadcast %19 : f32 to vector<1x8x128xf32>
      %c0_13 = arith.constant 0 : index
      %c0_14 = arith.constant 0 : index
      %c0_15 = arith.constant 0 : index
      %21 = vector.load %arg4[%c0_13, %c0_14, %c0_15] : memref<1x8x128xf32, #tpu.memory_space<vmem>>, vector<1x8x128xf32>
      tpu.vector_store %arg4[%c0_13, %c0_14, %c0_15], %20 {strides = array<i32>} : memref<1x8x128xf32, #tpu.memory_space<vmem>>, vector<1x8x128xf32>,
    } else {
    }
    return
  }
  func.func @transform_0(%arg0: i32, %arg1: i32) -> (i32, i32) {
    %c1_i32 = arith.constant 1 : i32
    %0 = arith.muli %arg0, %c1_i32 : i32
    %1 = arith.addi %0, %arg1 : i32
    %c0_i32 = arith.constant 0 : i32
    %c0_i32_0 = arith.constant 0 : i32
    return %1, %c0_i32 : i32, i32
  }
  func.func @transform_1(%arg0: i32, %arg1: i32) -> (i32, i32) {
    %c1_i32 = arith.constant 1 : i32
    %0 = arith.muli %arg0, %c1_i32 : i32
    %1 = arith.addi %0, %arg1 : i32
    %c0_i32 = arith.constant 0 : i32
    %c0_i32_0 = arith.constant 0 : i32
    return %1, %c0_i32 : i32, i32
  }
  func.func @transform_2(%arg0: i32, %arg1: i32) -> (i32, i32, i32) {
    %c0_i32 = arith.constant 0 : i32
    %c0_i32_0 = arith.constant 0 : i32
    %c0_i32_1 = arith.constant 0 : i32
    return %arg0, %c0_i32, %c0_i32_0 : i32, i32, i32
  }
}

</mosaic_0001>

<bundles_post_ra>
// kernel: custom_loss.1
= control target key start
LH: loop header
LB: loop body
LE: loop exit
PB: predicated region body
PF: predicated region fallthrough
CT: control target
= control target key end

     0   :  { %s138_s0 = inlined_call_operand.vmem [shape: f32[8,256], index: 0, kind: input, shape index: {}]   ;;  %s139_s1 = inlined_call_operand.vmem [shape: f32[8,256], index: 1, kind: input, shape index: {}]   ;;  %s140_s2 = inlined_call_operand.vmem [shape: f32[1,8,128], index: 2, kind: output, shape index: {}]  }
   0x1   :  { %v57_v0 = vld [vmem:[%s138_s0] sm:$0xff]  ;;  %v58_v1 = vld [vmem:[%s138_s0 + $0x8] sm:$0xff] }
   0x2   :  { %v59_v2 = vld [vmem:[%s139_s1] sm:$0xff]  ;;  %v60_v3 = vld [vmem:[%s139_s1 + $0x8] sm:$0xff] }
   0x3   :  { %v61_v4 = vsub.f32 %v57_v0, %v59_v2  ;;  %v62_v5 = vsub.f32 %v58_v1, %v60_v3 }
   0x5   :  { %v65_v6 = vmul.f32 %v61_v4, %v61_v4  ;;  %v66_v7 = vmul.f32 %v62_v5, %v62_v5 }
   0x7   :  { %v78_v8 = vadd.f32 %v66_v7, %v65_v6 }
   0x9   :  { %79 = vadd.xlane.f32.xlu0 %v78_v8 }
  0x96   :  { %v80_v9 = vpop.xlane.xlu0 %79 }
  0x97   :  { %v81_v10 = vrot.slane %v80_v9, 4 }
  0x99   :  { %v82_v11 = vadd.f32 %v81_v10, %v80_v9 }
  0x9b   :  { %v83_v12 = vrot.slane %v82_v11, 2 }
  0x9d   :  { %v84_v13 = vadd.f32 %v83_v12, %v82_v11 }
  0x9f   :  { %v85_v14 = vrot.slane %v84_v13, 1 }
  0xa1   :  { %v86_v15 = vadd.f32 %v85_v14, %v84_v13 }
  0xa3   :  { %106 = vpush %v86_v15 }
  0xd4   :  { %s107_s0 = spop %106 }
  0xd5   :  { %v88_v16 = vstv %s107_s0 }
  0xd6   :  { %89 = vst [vmem:[%s140_s2] sm:$0xff] %v88_v16 }

</bundles_post_ra>
